<compile_context>
chip_gen: v5e
topology: v5e:2x2
jax: 0.10.0
libtpu: 0.0.40
codegen_flags: <defaults>
</compile_context>

<pallas_src>
import math
import functools

import jax
import jax.numpy as jnp
from jax.experimental import pallas as pl
from jax.experimental.pallas import tpu as pltpu


def _round_up(v, m):
    return ((v + m - 1) // m) * m


def _adj_spmm_kernel(adj_ref, sup_ref, bias_ref, out_ref, *scratch,
                     tile_k, resident_support):
    """out[i-tile] = sum_k adj[i-tile, k-tile] @ support[k-tile, :] + bias.

    f32 accumulation happens either directly in the (resident, f32) output block
    or in a dedicated VMEM scratch when the output dtype is narrower.
    """
    acc_ref = scratch[0] if scratch else out_ref
    k = pl.program_id(1)

    @pl.when(k == 0)
    def _():
        acc_ref[...] = jnp.zeros_like(acc_ref)

    if resident_support:
        # Whole support lives in VMEM (DMA'd once); slice the current K block.
        ks = pl.multiple_of(k * tile_k, tile_k)
        sup_blk = sup_ref[pl.ds(ks, tile_k), :]
    else:
        sup_blk = sup_ref[...]

    acc_ref[...] += jnp.dot(adj_ref[...], sup_blk,
                            preferred_element_type=jnp.float32)

    @pl.when(k == pl.num_programs(1) - 1)
    def _():
        out_ref[...] = (acc_ref[...].astype(jnp.float32)
                        + bias_ref[...].astype(jnp.float32)).astype(out_ref.dtype)


@functools.partial(jax.jit, static_argnames=("tile_n", "tile_k", "compute_dtype",
                                              "out_dtype", "resident_support"))
def proto_graph_convolution(x, adj, weight, bias=None,
                            task_gate_weight=None, task_gate_bias=None,
                            *, tile_n=512, tile_k=1024,
                            compute_dtype=None, out_dtype=None,
                            resident_support=None):
    """Pallas implementation of Proto_GraphConvolution.forward (module_type='sigmoid').

    compute_dtype=None streams adj/support in adj's stored dtype (zero-copy when
    tile-aligned).  out_dtype defaults to float32 (matches the PyTorch reference).
    resident_support: None=auto, True/False to force the support streaming mode.
    """
    n, _ = x.shape
    f_out = weight.shape[1]
    assert adj.shape == (n, n)

    out_dtype = jnp.float32 if out_dtype is None else out_dtype
    adj_dtype = adj.dtype if compute_dtype is None else jnp.dtype(compute_dtype)
    sup_dtype = adj_dtype

    # ---- fold optional sigmoid task-gates into the parameters (wrapper-side) ----
    w_eff = weight if task_gate_weight is None else weight * task_gate_weight
    if bias is None:
        b_eff = jnp.zeros((f_out,), jnp.float32)
    else:
        b_eff = bias if task_gate_bias is None else bias * task_gate_bias
        b_eff = b_eff.reshape(f_out).astype(jnp.float32)

    # ---- hoist the loop-invariant feature transform out of the kernel ----
    support = jnp.dot(x.astype(jnp.float32), w_eff.astype(jnp.float32))

    # ---- lane-dense output: pad F_out up to a multiple of 128 ----
    f_out_pad = _round_up(f_out, 128)

    # ---- tile sizing (8/128-aligned, clamped to the graph size) ----
    tile_n = _round_up(max(8, min(int(tile_n), _round_up(n, 8))), 8)
    tile_k = _round_up(max(128, min(int(tile_k), _round_up(n, 128))), 128)

    # Keep >= 2 row tiles so the "parallel" axis feeds both TensorCores on v7x.
    if _round_up(n, tile_n) // tile_n < 2 and n > 8:
        tile_n = _round_up((n + 1) // 2, 8)

    adj_bytes = jnp.dtype(adj_dtype).itemsize
    sup_bytes = jnp.dtype(sup_dtype).itemsize
    out_bytes = jnp.dtype(out_dtype).itemsize
    use_acc = jnp.dtype(out_dtype) != jnp.dtype(jnp.float32)

    vmem_budget = 24 * 2**20  # conservative: fits v7x (64 MiB phys) comfortably

    def _estimate(tn, tk):
        ncols = _round_up(n, tk)
        if resident_support is None:
            res = 2 * ncols * f_out_pad * sup_bytes <= 8 * 2**20
        else:
            res = bool(resident_support)
        est = 2 * tn * tk * adj_bytes                            # adj, double-buffered
        est += (2 * ncols * f_out_pad * sup_bytes) if res \
            else (2 * tk * f_out_pad * sup_bytes)                # support
        est += 2 * tn * f_out_pad * out_bytes                    # output
        if use_acc:
            est += tn * f_out_pad * 4                            # f32 accumulator
        est += 8 * f_out_pad * 4                                 # bias (padded rows)
        return est, res

    for _ in range(16):  # shrink tiles until the working set fits the VMEM budget
        est, resident = _estimate(tile_n, tile_k)
        if est <= vmem_budget:
            break
        if tile_k > 512:
            tile_k = max(128, _round_up(tile_k // 2, 128))
        elif tile_n > 128:
            tile_n = max(8, _round_up(tile_n // 2, 8))
        elif tile_k > 128:
            tile_k = max(128, _round_up(tile_k // 2, 128))
        else:
            break
    est, resident = _estimate(tile_n, tile_k)

    n_rows = _round_up(n, tile_n)
    n_cols = _round_up(n, tile_k)

    # ---- adj: avoid the padded/cast HBM copy whenever possible ----
    if n_rows == n and n_cols == n:
        adj_p = adj if adj.dtype == jnp.dtype(adj_dtype) else adj.astype(adj_dtype)
    else:
        adj_p = jnp.zeros((n_rows, n_cols), adj_dtype).at[:n, :n].set(
            adj.astype(adj_dtype))

    if n_cols == n and f_out_pad == f_out:
        sup_p = support.astype(sup_dtype)
    else:
        sup_p = jnp.zeros((n_cols, f_out_pad), sup_dtype).at[:n, :f_out].set(
            support.astype(sup_dtype))
    b_p = jnp.zeros((1, f_out_pad), jnp.float32).at[0, :f_out].set(b_eff)

    grid = (n_rows // tile_n, n_cols // tile_k)

    if resident:
        # Whole support resident in VMEM; DMA'd once (constant block index).
        sup_spec = pl.BlockSpec((n_cols, f_out_pad), lambda i, k: (0, 0))
    else:
        sup_spec = pl.BlockSpec((tile_k, f_out_pad), lambda i, k: (k, 0))

    scratch = [pltpu.VMEM((tile_n, f_out_pad), jnp.float32)] if use_acc else []

    kernel = functools.partial(_adj_spmm_kernel, tile_k=int(tile_k),
                               resident_support=bool(resident))

    sup_reads = 1 if resident else (n_rows // tile_n)
    cost = pl.CostEstimate(
        flops=2 * n_rows * n_cols * f_out_pad,
        transcendentals=0,
        bytes_accessed=(n_rows * n_cols * adj_bytes
                        + sup_reads * n_cols * f_out_pad * sup_bytes
                        + n_rows * f_out_pad * out_bytes),
    )

    out = pl.pallas_call(
        kernel,
        out_shape=jax.ShapeDtypeStruct((n_rows, f_out_pad), out_dtype),
        grid_spec=pltpu.PrefetchScalarGridSpec(
            num_scalar_prefetch=0,
            grid=grid,
            in_specs=[
                pl.BlockSpec((tile_n, tile_k), lambda i, k: (i, k)),   # adj tile
                sup_spec,                                              # support
                pl.BlockSpec((1, f_out_pad), lambda i, k: (0, 0)),     # bias
            ],
            out_specs=pl.BlockSpec((tile_n, f_out_pad), lambda i, k: (i, 0)),
            scratch_shapes=scratch,
        ),
        compiler_params=pltpu.CompilerParams(
            dimension_semantics=("parallel", "arbitrary"),
            vmem_limit_bytes=int(min(40 * 2**20,
                                     max(16 * 2**20, est + 8 * 2**20))),
        ),
        cost_estimate=cost,
    )(adj_p, sup_p, b_p)

    return out[:n, :f_out]


def _reference(x, adj, weight, bias, gw=None, gb=None):
    w = weight if gw is None else weight * gw
    support = x @ w
    out = adj @ support
    if bias is not None:
        out = out + (bias if gb is None else bias * gb)
    return out


if __name__ == "__main__":
    key = jax.random.PRNGKey(0)
    k_w, k_b, k_x, k_a, k_gw, k_gb = jax.random.split(key, 6)

    # Small-but-multi-tile shapes: N nodes, in_features -> out_features.
    N, F_IN, F_OUT = 512, 32, 64

    # Deterministic init matching reset_parameters(): uniform(-stdv, stdv),
    # stdv = 1/sqrt(out_features).
    stdv = 1.0 / math.sqrt(F_OUT)
    weight = jax.random.uniform(k_w, (F_IN, F_OUT), jnp.float32, -stdv, stdv)
    bias = jax.random.uniform(k_b, (F_OUT,), jnp.float32, -stdv, stdv)

    x = jax.random.normal(k_x, (N, F_IN), jnp.float32)
    # Row-normalized random adjacency (dense stand-in for the sparse adj).
    adj_raw = jax.random.uniform(k_a, (N, N), jnp.float32)
    adj = adj_raw / jnp.sum(adj_raw, axis=1, keepdims=True)

    # Case 1: plain GCN path, explicit small tiles -> multi-tile grid on both axes,
    #         resident support, direct-f32-output accumulation.
    out1 = jax.block_until_ready(
        proto_graph_convolution(x, adj, weight, bias, tile_n=128, tile_k=256))
    ref1 = _reference(x, adj, weight, bias)
    assert out1.shape == ref1.shape and out1.dtype == jnp.float32
    assert jnp.allclose(out1, ref1, atol=1e-4, rtol=1e-4), "no-gate f32 path mismatch"

    # Case 2: sigmoid task gates, default tiles (zero-copy f32 adj streaming,
    #         megacore split into 2 row tiles).
    gate_w = jax.nn.sigmoid(jax.random.normal(k_gw, (F_IN, F_OUT), jnp.float32))
    gate_b = jax.nn.sigmoid(jax.random.normal(k_gb, (F_OUT,), jnp.float32))
    out2 = jax.block_until_ready(
        proto_graph_convolution(x, adj, weight, bias,
                                task_gate_weight=gate_w, task_gate_bias=gate_b))
    ref2 = _reference(x, adj, weight, bias, gate_w, gate_b)
    assert jnp.allclose(out2, ref2, atol=1e-4, rtol=1e-4), "gated f32 path mismatch"

    # Case 3: no bias, force the non-resident (K-strip streaming) support path.
    out3 = jax.block_until_ready(
        proto_graph_convolution(x, adj, weight, None,
                                tile_n=128, tile_k=128, resident_support=False))
    ref3 = _reference(x, adj, weight, None)
    assert jnp.allclose(out3, ref3, atol=1e-4, rtol=1e-4), "no-bias strip path mismatch"

    # Case 4: bf16 streaming + bf16 output (exercises the f32 acc-scratch path).
    #         Use compute_dtype=float32 (default) for numerically sensitive graphs.
    out4 = jax.block_until_ready(
        proto_graph_convolution(x, adj, weight, bias,
                                compute_dtype=jnp.bfloat16,
                                out_dtype=jnp.bfloat16))
    ref4 = _reference(x, adj, weight, bias)
    assert out4.dtype == jnp.bfloat16
    assert jnp.allclose(out4.astype(jnp.float32), ref4,
                        atol=2e-2, rtol=5e-2), "bf16 path mismatch"

    print("KERNEL_OK")
</pallas_src>

<mosaic_0001>
module attributes {stable_mosaic.version = 11 : i64} {
  func.func @_adj_spmm_kernel(%arg0: i32, %arg1: i32, %arg2: memref<128x256xf32, #tpu.memory_space<vmem>>, %arg3: memref<512x128xf32, #tpu.memory_space<vmem>>, %arg4: memref<1x128xf32, #tpu.memory_space<vmem>>, %arg5: memref<128x128xf32, #tpu.memory_space<vmem>>) attributes {dimension_semantics = [#tpu.dimension_semantics<parallel>, #tpu.dimension_semantics<arbitrary>], iteration_bounds = array<i64: 4, 2>, scalar_prefetch = 0 : i64, scratch_operands = 0 : i64, tpu.core_type = #tpu.core_type<tc>, window_params = [{transform_indices = @transform_0, window_bounds = array<i64: 128, 256>}, {pipeline_mode = #tpu.pipeline_mode<synchronous>, transform_indices = @transform_1, window_bounds = array<i64: 512, 128>}, {pipeline_mode = #tpu.pipeline_mode<synchronous>, transform_indices = @transform_2, window_bounds = array<i64: 1, 128>}, {transform_indices = @transform_3, window_bounds = array<i64: 128, 128>}]} {
    %c0_i32 = arith.constant 0 : i32
    %0 = arith.cmpi eq, %arg1, %c0_i32 : i32
    %1 = arith.extui %0 : i1 to i32
    %c0_i32_0 = arith.constant 0 : i32
    %2 = arith.cmpi ne, %1, %c0_i32_0 : i32
    scf.if %2 {
      %cst_8 = arith.constant 0.000000e+00 : f32
      %15 = vector.broadcast %cst_8 : f32 to vector<128x128xf32>
      %c0_9 = arith.constant 0 : index
      %c0_10 = arith.constant 0 : index
      %16 = vector.load %arg5[%c0_9, %c0_10] : memref<128x128xf32, #tpu.memory_space<vmem>>, vector<128x128xf32>
      tpu.vector_store %arg5[%c0_9, %c0_10], %15 {strides = array<i32>} : memref<128x128xf32, #tpu.memory_space<vmem>>, vector<128x128xf32>,
    } else {
    }
    %c256_i32 = arith.constant 256 : i32
    %3 = arith.muli %arg1, %c256_i32 : i32
    %4 = tpu.assume_multiple %3, 256 : i32
    %5 = arith.index_cast %4 : i32 to index
    %c0 = arith.constant 0 : index
    %6 = vector.load %arg3[%5, %c0] : memref<512x128xf32, #tpu.memory_space<vmem>>, vector<256x128xf32>
    %c0_1 = arith.constant 0 : index
    %c0_2 = arith.constant 0 : index
    %7 = vector.load %arg5[%c0_1, %c0_2] : memref<128x128xf32, #tpu.memory_space<vmem>>, vector<128x128xf32>
    %c0_3 = arith.constant 0 : index
    %c0_4 = arith.constant 0 : index
    %8 = vector.load %arg2[%c0_3, %c0_4] : memref<128x256xf32, #tpu.memory_space<vmem>>, vector<128x256xf32>
    %cst = arith.constant dense<0.000000e+00> : vector<128x128xf32>
    %9 = tpu.matmul %8, %6, %cst {dimension_numbers = #tpu.dot_dimension_numbers<[1], [0], [0], [1], [0, 0, 1, 1], [], []>} : vector<128x256xf32>, vector<256x128xf32>, vector<128x128xf32> -> vector<128x128xf32>
    %10 = arith.addf %7, %9 : vector<128x128xf32>
    %c0_5 = arith.constant 0 : index
    %c0_6 = arith.constant 0 : index
    %11 = vector.load %arg5[%c0_5, %c0_6] : memref<128x128xf32, #tpu.memory_space<vmem>>, vector<128x128xf32>
    tpu.vector_store %arg5[%c0_5, %c0_6], %10 {strides = array<i32>} : memref<128x128xf32, #tpu.memory_space<vmem>>, vector<128x128xf32>,
    %c1_i32 = arith.constant 1 : i32
    %12 = arith.cmpi eq, %arg1, %c1_i32 : i32
    %13 = arith.extui %12 : i1 to i32
    %c0_i32_7 = arith.constant 0 : i32
    %14 = arith.cmpi ne, %13, %c0_i32_7 : i32
    scf.if %14 {
      %c0_8 = arith.constant 0 : index
      %c0_9 = arith.constant 0 : index
      %15 = vector.load %arg5[%c0_8, %c0_9] : memref<128x128xf32, #tpu.memory_space<vmem>>, vector<128x128xf32>
      %c0_10 = arith.constant 0 : index
      %c0_11 = arith.constant 0 : index
      %16 = vector.load %arg4[%c0_10, %c0_11] : memref<1x128xf32, #tpu.memory_space<vmem>>, vector<1x128xf32>
      %17 = vector.broadcast %16 : vector<1x128xf32> to vector<128x128xf32>
      %18 = arith.addf %15, %17 : vector<128x128xf32>
      %c0_12 = arith.constant 0 : index
      %c0_13 = arith.constant 0 : index
      %19 = vector.load %arg5[%c0_12, %c0_13] : memref<128x128xf32, #tpu.memory_space<vmem>>, vector<128x128xf32>
      tpu.vector_store %arg5[%c0_12, %c0_13], %18 {strides = array<i32>} : memref<128x128xf32, #tpu.memory_space<vmem>>, vector<128x128xf32>,
    } else {
    }
    return
  }
  func.func @transform_0(%arg0: i32, %arg1: i32) -> (i32, i32) {
    %c0_i32 = arith.constant 0 : i32
    return %arg0, %arg1 : i32, i32
  }
  func.func @transform_1(%arg0: i32, %arg1: i32) -> (i32, i32) {
    %c0_i32 = arith.constant 0 : i32
    %c0_i32_0 = arith.constant 0 : i32
    %c0_i32_1 = arith.constant 0 : i32
    return %c0_i32, %c0_i32_0 : i32, i32
  }
  func.func @transform_2(%arg0: i32, %arg1: i32) -> (i32, i32) {
    %c0_i32 = arith.constant 0 : i32
    %c0_i32_0 = arith.constant 0 : i32
    %c0_i32_1 = arith.constant 0 : i32
    return %c0_i32, %c0_i32_0 : i32, i32
  }
  func.func @transform_3(%arg0: i32, %arg1: i32) -> (i32, i32) {
    %c0_i32 = arith.constant 0 : i32
    %c0_i32_0 = arith.constant 0 : i32
    return %arg0, %c0_i32 : i32, i32
  }
}

</mosaic_0001>

<bundles_post_ra>
// kernel: proto_graph_convolution.1
= control target key start
LH: loop header
LB: loop body
LE: loop exit
PB: predicated region body
PF: predicated region fallthrough
CT: control target
= control target key end

     0   :  { %8 = vsyncpa [#allocation3], 0  ;;  %s1137_s0 = inlined_call_operand.hbm [shape: f32[512,512], index: 0, kind: input, shape index: {}]   ;;  %s1138_s1 = inlined_call_operand.vmem [shape: f32[512,128], index: 1, kind: input, shape index: {}]   ;;  %s1139_s2 = inlined_call_operand.vmem [shape: f32[1,128], index: 2, kind: input, shape index: {}]   ;;  %s1140_s3 = inlined_call_operand.vmem [shape: f32[512,128], index: 3, kind: output, shape index: {}]  }
   0x1   :  { %10 = vsyncpa [#allocation3 + $0x1], 0  ;;  %s866_s12 = smov 0   ;;  %s868_s13 = smov 0  }
   0x2   :  { %s870_s14 = smov 0   ;;  %s872_s15 = smov 0  }
   0x3   :  { %s874_s16 = smov 0   ;;  %s876_s17 = smov 0  }
   0x4   :  { %s878_s18 = smov 0   ;;  %s880_s19 = smov 0  }
   0x5 LB: > { %s617_s20 = sadd.s32 4294967295, %s840_s19   ;;  %s25_s21 = sadd.s32 1, %s832_s17  ;;  %s840_s19 = sphi %s880_s19, %s16_s19   ;;  %s836_s18 = sphi %s878_s18, %s1152_s18   ;;  %s832_s17 = sphi %s876_s17, %s1151_s17   ;;  %s828_s16 = sphi %s874_s16, %s1150_s16   ;;  %s824_s15 = sphi %s872_s15, %s1149_s15   ;;  %s820_s14 = sphi %s870_s14, %s1148_s14   ;;  %s816_s13 = sphi %s868_s13, %s1147_s13   ;;  %s812_s12 = sphi %s866_s12, %s1146_s12  }
   0x6   : > { %p26_p0 = scmp.ge.s32.totalorder %s25_s21, 2  ;;  %s28_s22 = sadd.s32 1, %s836_s18 }
   0x7   : > { %s37_s23 = sadd.s32 1, %s820_s14  ;;  %p44_p1 = scmp.ne.s32.totalorder %s820_s14, %s816_s13 }
   0x8   : > { %s1154_s21 = smov (%p26_p0, %s25_s21), 0  ;;  %s1156_s22 = smov (!%p26_p0, %s28_s22), %s836_s18 }
   0x9   : > { %s33_s24 = ssub.s32 %s832_s17, %s1154_s21  ;;  %p45_p2 = scmp.eq.s32.totalorder %s840_s19, 0 }
   0xa   : > { %p30_p3 = scmp.ge.s32.totalorder %s1156_s22, 4  ;;  %p50_p4 = scmp.ne.s32.totalorder %s816_s13, %s812_s12 }
   0xb   : > { %p917_p5 = por %p45_p2, %p44_p1  ;;  %p51_p6 = scmp.eq.s32.totalorder %s617_s20, 0 }
   0xc   : > { %s1158_s22 = smov (%p30_p3, %s1156_s22), 0  ;;  %p674_p8 = scmp.lt.s32.totalorder %s840_s19, 8 }
   0xd   : > { %1143 = sst [smem:[#allocation5_spill]] %s1158_s22  ;;  %p923_p7 = por %p51_p6, %p50_p4 }
   0xe   : > { %s32_s27 = ssub.s32 %s836_s18, %s1158_s22  ;;  %s148_s29 = sand.u32 1, %s820_s14  }
   0xf   : > { %s34_s28 = sor.u32 %s33_s24, %s32_s27  ;;  %s621_s30 = sshll.u32 %s148_s29, 8 }
  0x10   : > { %p35_p9 = scmp.eq.s32.totalorder %s34_s28, 0  ;;  %s623_s4 = sshll.u32 %s832_s17, 1 }
  0x11   : > { %s635_s6 = sshll.u32 %s836_s18, 6  ;;  %s152_s8 = scalar_lea.vmem [#allocation2], %s621_s30 }
  0x12   : > { %s933_s5 = scalar_select %p35_p9, %s820_s14, %s37_s23  }
  0x13   : > { %s158_s7 = sadd.s32 %s635_s6, %s623_s4  ;;  %s163_s9 = sshll.u32 %s152_s8, 4  ;;  %s164_s9 = int_to_ptr.vmem [resolvable:$true] %s163_s9 }
  0x14   : > { %s625_s10 = sshll.u32 %s158_s7, 3  ;;  %p671_p10 = pnand %p674_p8, %p917_p5 }
  0x15   : > { %s160_s20 = scalar_lea.hbm %s1137_s0, %s625_s10  ;;  %s149_s27 = scalar_lea.sflag [#allocation3], %s148_s29 }
  0x16   : > { %s161_s24 = sshll.u32 %s160_s20, 4  ;;  %s842_s23 = smov 512   ;;  %s162_s24 = int_to_ptr.hbm [resolvable:$true] %s161_s24 }
  0x17   : > { %s843_s28 = smov 256   ;;  %s844_s22 = smov 16  }
  0x18   : > { %673 = dma.hbm_to_vmem [thread:$0]  (!%p671_p10), %s162_s24, 4096, %s164_s9, %s149_s27, %s842_s23, %s843_s28, %s844_s22  }
  0x19   : > { %p626_p11 = scmp.ge.s32.totalorder %s840_s19, 1  ;;  %p171_p12 = scmp.lt.s32.totalorder %s840_s19, 9 }
  0x1b   : > { %p172_p13 = pnand %p626_p11, %p171_p12 }
  0x1c   : > { %s177_s30 = sand.u32 (!%p172_p13), 1, %s816_s13  }
  0x1d   : > { %175 = sbr.rel (%p172_p13) target bundleno = 307 (0x133), region = 32  ;;  %s627_s4 = sshll.u32 (!%p172_p13), %s177_s30, 8 }
  0x1e   : > { %s178_s6 = scalar_lea.sflag (!%p172_p13), [#allocation3], %s177_s30  ;;  %s946_s7 = scalar_lea.vmem (!%p172_p13), [#allocation2], %s627_s4 }
  0x22   : > { %807 = dma.done.wait (%p923_p7), %s178_s6, 4096  }
  0x23   : > { %809 = vsyncadd (%p923_p7), %s178_s6, 4294963200  ;;  %s628_s25 = sshll.u32 %s828_s16, 4  ;;  %p630_p1 = scmp.ne.s32.totalorder %s824_s15, 0 }
  0x24   : > { %p208_p0 = scmp.lt.s32.totalorder %s628_s25, 63 }
  0x25   : > { %216 = sbr.rel (%p630_p1) target bundleno = 59 (0x3b), region = 40 }
  0x26   : > { %s1160_s25 = smov (!%p208_p0, %s628_s25), 63 }
  0x27   : > { %s629_s22 = sshll.u32 %s1160_s25, 3 }
  0x28   : > { %s956_s9 = scalar_lea.vmem %s1140_s3, %s629_s22 }
  0x2a   : > { %v845_v0 = vmov 0.0  }
  0x2b   : > { %217 = vst [vmem:[%s956_s9] sm:$0xff] %v845_v0 }
  0x2c   : > { %218 = vst [vmem:[%s956_s9 + $0x8] sm:$0xff] %v845_v0 }
  0x2d   : > { %219 = vst [vmem:[%s956_s9 + $0x10] sm:$0xff] %v845_v0 }
  0x2e   : > { %220 = vst [vmem:[%s956_s9 + $0x18] sm:$0xff] %v845_v0 }
  0x2f   : > { %221 = vst [vmem:[%s956_s9 + $0x20] sm:$0xff] %v845_v0 }
  0x30   : > { %222 = vst [vmem:[%s956_s9 + $0x28] sm:$0xff] %v845_v0 }
  0x31   : > { %223 = vst [vmem:[%s956_s9 + $0x30] sm:$0xff] %v845_v0 }
  0x32   : > { %224 = vst [vmem:[%s956_s9 + $0x38] sm:$0xff] %v845_v0 }
  0x33   : > { %225 = vst [vmem:[%s956_s9 + $0x40] sm:$0xff] %v845_v0 }
  0x34   : > { %226 = vst [vmem:[%s956_s9 + $0x48] sm:$0xff] %v845_v0 }
  0x35   : > { %227 = vst [vmem:[%s956_s9 + $0x50] sm:$0xff] %v845_v0 }
  0x36   : > { %228 = vst [vmem:[%s956_s9 + $0x58] sm:$0xff] %v845_v0 }
  0x37   : > { %229 = vst [vmem:[%s956_s9 + $0x60] sm:$0xff] %v845_v0 }
  0x38   : > { %230 = vst [vmem:[%s956_s9 + $0x68] sm:$0xff] %v845_v0 }
  0x39   : > { %231 = vst [vmem:[%s956_s9 + $0x70] sm:$0xff] %v845_v0 }
  0x3a   : > { %232 = vst [vmem:[%s956_s9 + $0x78] sm:$0xff] %v845_v0 }
  0x3b PF: > { %s631_s16 = sshll.u32 %s824_s15, 8  ;;  %v299_v33 = vld [vmem:[%s946_s7 + $0x80] sm:$0xff]  ;;  %v300_v34 = vld [vmem:[%s946_s7 + $0x88] sm:$0xff]  ;;  %v301_v37 = vld [vmem:[%s946_s7 + $0x90] sm:$0xff]  ;;  %p632_p2 = scmp.ne.s32.totalorder %s824_s15, 1 }
  0x3c   : > { %s979_s11 = scalar_lea.vmem %s1138_s1, %s631_s16  ;;  %v283_v35 = vld [vmem:[%s946_s7] sm:$0xff]  ;;  %v284_v36 = vld [vmem:[%s946_s7 + $0x8] sm:$0xff]  ;;  %v302_v38 = vld [vmem:[%s946_s7 + $0x98] sm:$0xff] }
  0x3d   : > { %v250_v1 = vld [vmem:[%s979_s11 + $0x78] sm:$0xff]  ;;  %v249_v3 = vld [vmem:[%s979_s11 + $0x70] sm:$0xff]  ;;  %v248_v5 = vld [vmem:[%s979_s11 + $0x68] sm:$0xff] }
  0x3e   : > { %v266_v2 = vld [vmem:[%s979_s11 + $0xf8] sm:$0xff]  ;;  %636 = vmatpush.msra.mxu2 %v250_v1  ;;  %v265_v4 = vld [vmem:[%s979_s11 + $0xf0] sm:$0xff]  ;;  %v264_v6 = vld [vmem:[%s979_s11 + $0xe8] sm:$0xff]  ;;  %315 = vmatpush.msra.mxu0 %v250_v1 }
  0x3f   : > { %652 = vmatpush.msra.mxu3 %v266_v2  ;;  %380 = vmatpush.msra.mxu1 %v266_v2  ;;  %v247_v7 = vld [vmem:[%s979_s11 + $0x60] sm:$0xff]  ;;  %v246_v9 = vld [vmem:[%s979_s11 + $0x58] sm:$0xff]  ;;  %v245_v11 = vld [vmem:[%s979_s11 + $0x50] sm:$0xff] }
  0x40   : > { %637 = vmatpush.msra.mxu2 %v249_v3  ;;  %v263_v8 = vld [vmem:[%s979_s11 + $0xe0] sm:$0xff]  ;;  %316 = vmatpush.msra.mxu0 %v249_v3  ;;  %v262_v10 = vld [vmem:[%s979_s11 + $0xd8] sm:$0xff]  ;;  %v261_v12 = vld [vmem:[%s979_s11 + $0xd0] sm:$0xff] }
  0x41   : > { %653 = vmatpush.msra.mxu3 %v265_v4  ;;  %381 = vmatpush.msra.mxu1 %v265_v4  ;;  %v244_v13 = vld [vmem:[%s979_s11 + $0x48] sm:$0xff]  ;;  %v243_v15 = vld [vmem:[%s979_s11 + $0x40] sm:$0xff]  ;;  %v242_v17 = vld [vmem:[%s979_s11 + $0x38] sm:$0xff] }
  0x42   : > { %638 = vmatpush.msra.mxu2 %v248_v5  ;;  %317 = vmatpush.msra.mxu0 %v248_v5  ;;  %v260_v14 = vld [vmem:[%s979_s11 + $0xc8] sm:$0xff]  ;;  %v259_v16 = vld [vmem:[%s979_s11 + $0xc0] sm:$0xff]  ;;  %v258_v18 = vld [vmem:[%s979_s11 + $0xb8] sm:$0xff] }
  0x43   : > { %654 = vmatpush.msra.mxu3 %v264_v6  ;;  %382 = vmatpush.msra.mxu1 %v264_v6  ;;  %v241_v19 = vld [vmem:[%s979_s11 + $0x30] sm:$0xff]  ;;  %v240_v21 = vld [vmem:[%s979_s11 + $0x28] sm:$0xff]  ;;  %v239_v23 = vld [vmem:[%s979_s11 + $0x20] sm:$0xff] }
  0x44   : > { %639 = vmatpush.msra.mxu2 %v247_v7  ;;  %318 = vmatpush.msra.mxu0 %v247_v7  ;;  %v257_v20 = vld [vmem:[%s979_s11 + $0xb0] sm:$0xff]  ;;  %v256_v22 = vld [vmem:[%s979_s11 + $0xa8] sm:$0xff]  ;;  %v255_v24 = vld [vmem:[%s979_s11 + $0xa0] sm:$0xff] }
  0x45   : > { %655 = vmatpush.msra.mxu3 %v263_v8  ;;  %383 = vmatpush.msra.mxu1 %v263_v8  ;;  %v238_v25 = vld [vmem:[%s979_s11 + $0x18] sm:$0xff]  ;;  %v237_v27 = vld [vmem:[%s979_s11 + $0x10] sm:$0xff]  ;;  %v236_v29 = vld [vmem:[%s979_s11 + $0x8] sm:$0xff] }
  0x46   : > { %640 = vmatpush.msra.mxu2 %v246_v9  ;;  %319 = vmatpush.msra.mxu0 %v246_v9  ;;  %v254_v26 = vld [vmem:[%s979_s11 + $0x98] sm:$0xff]  ;;  %v253_v28 = vld [vmem:[%s979_s11 + $0x90] sm:$0xff]  ;;  %v252_v30 = vld [vmem:[%s979_s11 + $0x88] sm:$0xff] }
  0x47   : > { %656 = vmatpush.msra.mxu3 %v262_v10  ;;  %384 = vmatpush.msra.mxu1 %v262_v10  ;;  %v235_v31 = vld [vmem:[%s979_s11] sm:$0xff]  ;;  %v285_v39 = vld [vmem:[%s946_s7 + $0x10] sm:$0xff]  ;;  %v286_v40 = vld [vmem:[%s946_s7 + $0x18] sm:$0xff] }
  0x48   : > { %641 = vmatpush.msra.mxu2 %v245_v11  ;;  %320 = vmatpush.msra.mxu0 %v245_v11  ;;  %v251_v32 = vld [vmem:[%s979_s11 + $0x80] sm:$0xff]  ;;  %v304_v42 = vld [vmem:[%s946_s7 + $0xa8] sm:$0xff]  ;;  %v305_v45 = vld [vmem:[%s946_s7 + $0xb0] sm:$0xff] }
  0x49   : > { %657 = vmatpush.msra.mxu3 %v261_v12  ;;  %385 = vmatpush.msra.mxu1 %v261_v12  ;;  %v303_v41 = vld [vmem:[%s946_s7 + $0xa0] sm:$0xff]  ;;  %v288_v44 = vld [vmem:[%s946_s7 + $0x28] sm:$0xff]  ;;  %v306_v46 = vld [vmem:[%s946_s7 + $0xb8] sm:$0xff] }
  0x4a   : > { %642 = vmatpush.msra.mxu2 %v244_v13  ;;  %321 = vmatpush.msra.mxu0 %v244_v13  ;;  %v287_v43 = vld [vmem:[%s946_s7 + $0x20] sm:$0xff]  ;;  %v289_v47 = vld [vmem:[%s946_s7 + $0x30] sm:$0xff]  ;;  %v290_v48 = vld [vmem:[%s946_s7 + $0x38] sm:$0xff] }
  0x4b   : > { %658 = vmatpush.msra.mxu3 %v260_v14  ;;  %386 = vmatpush.msra.mxu1 %v260_v14  ;;  %v307_v49 = vld [vmem:[%s946_s7 + $0xc0] sm:$0xff]  ;;  %v308_v50 = vld [vmem:[%s946_s7 + $0xc8] sm:$0xff]  ;;  %v309_v53 = vld [vmem:[%s946_s7 + $0xd0] sm:$0xff] }
  0x4c   : > { %643 = vmatpush.msra.mxu2 %v243_v15  ;;  %322 = vmatpush.msra.mxu0 %v243_v15  ;;  %v291_v51 = vld [vmem:[%s946_s7 + $0x40] sm:$0xff]  ;;  %v292_v52 = vld [vmem:[%s946_s7 + $0x48] sm:$0xff]  ;;  %v310_v54 = vld [vmem:[%s946_s7 + $0xd8] sm:$0xff] }
  0x4d   : > { %659 = vmatpush.msra.mxu3 %v259_v16  ;;  %387 = vmatpush.msra.mxu1 %v259_v16  ;;  %v293_v55 = vld [vmem:[%s946_s7 + $0x50] sm:$0xff]  ;;  %v294_v56 = vld [vmem:[%s946_s7 + $0x58] sm:$0xff]  ;;  %v311_v57 = vld [vmem:[%s946_s7 + $0xe0] sm:$0xff] }
  0x4e   : > { %644 = vmatpush.msra.mxu2 %v242_v17  ;;  %323 = vmatpush.msra.mxu0 %v242_v17  ;;  %v312_v58 = vld [vmem:[%s946_s7 + $0xe8] sm:$0xff]  ;;  %v295_v59 = vld [vmem:[%s946_s7 + $0x60] sm:$0xff]  ;;  %v313_v61 = vld [vmem:[%s946_s7 + $0xf0] sm:$0xff] }
  0x4f   : > { %660 = vmatpush.msra.mxu3 %v258_v18  ;;  %388 = vmatpush.msra.mxu1 %v258_v18  ;;  %v296_v60 = vld [vmem:[%s946_s7 + $0x68] sm:$0xff]  ;;  %v314_v62 = vld [vmem:[%s946_s7 + $0xf8] sm:$0xff]  ;;  %v297_v63 = vld [vmem:[%s946_s7 + $0x70] sm:$0xff] }
  0x50   : > { %645 = vmatpush.msra.mxu2 %v241_v19  ;;  %324 = vmatpush.msra.mxu0 %v241_v19  ;;  %v298_v0 = vld [vmem:[%s946_s7 + $0x78] sm:$0xff]  ;;  %v267_v2 = vld [vmem:[%s956_s9] sm:$0xff]  ;;  %v268_v12 = vld [vmem:[%s956_s9 + $0x8] sm:$0xff] }
  0x51   : > { %661 = vmatpush.msra.mxu3 %v257_v20  ;;  %389 = vmatpush.msra.mxu1 %v257_v20  ;;  %v275_v7 = vld [vmem:[%s956_s9 + $0x40] sm:$0xff]  ;;  %v276_v17 = vld [vmem:[%s956_s9 + $0x48] sm:$0xff] }
  0x52   : > { %646 = vmatpush.msra.mxu2 %v240_v21  ;;  %325 = vmatpush.msra.mxu0 %v240_v21 }
  0x53   : > { %662 = vmatpush.msra.mxu3 %v256_v22  ;;  %390 = vmatpush.msra.mxu1 %v256_v22  ;;  %v269_v22 = vld [vmem:[%s956_s9 + $0x10] sm:$0xff] }
  0x54   : > { %647 = vmatpush.msra.mxu2 %v239_v23  ;;  %326 = vmatpush.msra.mxu0 %v239_v23 }
  0x55   : > { %663 = vmatpush.msra.mxu3 %v255_v24  ;;  %391 = vmatpush.msra.mxu1 %v255_v24 }
  0x56   : > { %648 = vmatpush.msra.mxu2 %v238_v25  ;;  %327 = vmatpush.msra.mxu0 %v238_v25 }
  0x57   : > { %664 = vmatpush.msra.mxu3 %v254_v26  ;;  %392 = vmatpush.msra.mxu1 %v254_v26 }
  0x58   : > { %649 = vmatpush.msra.mxu2 %v237_v27  ;;  %328 = vmatpush.msra.mxu0 %v237_v27  ;;  %v277_v27 = vld [vmem:[%s956_s9 + $0x50] sm:$0xff] }
  0x59   : > { %665 = vmatpush.msra.mxu3 %v253_v28  ;;  %393 = vmatpush.msra.mxu1 %v253_v28 }
  0x5a   : > { %650 = vmatpush.msra.mxu2 %v236_v29  ;;  %329 = vmatpush.msra.mxu0 %v236_v29 }
  0x5b   : > { %666 = vmatpush.msra.mxu3 %v252_v30  ;;  %394 = vmatpush.msra.mxu1 %v252_v30 }
  0x5c   : > { %651 = vmatpush.msra.mxu2 %v235_v31  ;;  %330 = vmatpush.msra.mxu0 %v235_v31 }
  0x5d   : > { %667 = vmatpush.msra.mxu3 %v251_v32  ;;  %355 = vmatmul.f32.vlgmr.msra.gmra.mxu2 %v299_v33 }
  0x5e   : > { %420 = vmatmul.f32.vlgmr.msra.gmra.mxu3 %v300_v34  ;;  %395 = vmatpush.msra.mxu1 %v251_v32  ;;  %v270_v32 = vld [vmem:[%s956_s9 + $0x18] sm:$0xff] }
  0x5f   : > { %331 = vmatmul.f32.vlgmr.msra.gmra.mxu0 %v283_v35  ;;  %396 = vmatmul.f32.vlgmr.msra.gmra.mxu1 %v284_v36 }
  0x65   : > { %358 = vmatmul.f32.gmra.mxu2 %v301_v37  ;;  %v278_v37 = vld [vmem:[%s956_s9 + $0x58] sm:$0xff] }
  0x66   : > { %423 = vmatmul.f32.gmra.mxu3 %v302_v38 }
  0x67   : > { %334 = vmatmul.f32.gmra.mxu0 %v285_v39  ;;  %399 = vmatmul.f32.gmra.mxu1 %v286_v40 }
  0x6d   : > { %361 = vmatmul.f32.gmra.mxu2 %v303_v41 }
  0x6e   : > { %426 = vmatmul.f32.gmra.mxu3 %v304_v42  ;;  %v271_v42 = vld [vmem:[%s956_s9 + $0x20] sm:$0xff] }
  0x6f   : > { %337 = vmatmul.f32.gmra.mxu0 %v287_v43  ;;  %402 = vmatmul.f32.gmra.mxu1 %v288_v44 }
  0x75   : > { %364 = vmatmul.f32.gmra.mxu2 %v305_v45 }
  0x76   : > { %429 = vmatmul.f32.gmra.mxu3 %v306_v46 }
  0x77   : > { %340 = vmatmul.f32.gmra.mxu0 %v289_v47  ;;  %405 = vmatmul.f32.gmra.mxu1 %v290_v48  ;;  %v279_v47 = vld [vmem:[%s956_s9 + $0x60] sm:$0xff] }
  0x7d   : > { %367 = vmatmul.f32.gmra.mxu2 %v307_v49 }
  0x7e   : > { %432 = vmatmul.f32.gmra.mxu3 %v308_v50 }
  0x7f   : > { %343 = vmatmul.f32.gmra.mxu0 %v291_v51  ;;  %408 = vmatmul.f32.gmra.mxu1 %v292_v52  ;;  %v272_v52 = vld [vmem:[%s956_s9 + $0x28] sm:$0xff] }
  0x85   : > { %370 = vmatmul.f32.gmra.mxu2 %v309_v53 }
  0x86   : > { %435 = vmatmul.f32.gmra.mxu3 %v310_v54 }
  0x87   : > { %346 = vmatmul.f32.gmra.mxu0 %v293_v55  ;;  %411 = vmatmul.f32.gmra.mxu1 %v294_v56 }
  0x8d   : > { %373 = vmatmul.f32.gmra.mxu2 %v311_v57  ;;  %v280_v57 = vld [vmem:[%s956_s9 + $0x68] sm:$0xff] }
  0x8e   : > { %438 = vmatmul.f32.gmra.mxu3 %v312_v58 }
  0x8f   : > { %349 = vmatmul.f32.gmra.mxu0 %v295_v59  ;;  %414 = vmatmul.f32.gmra.mxu1 %v296_v60 }
  0x95   : > { %376 = vmatmul.f32.gmra.mxu2 %v313_v61 }
  0x96   : > { %441 = vmatmul.f32.gmra.mxu3 %v314_v62  ;;  %v273_v62 = vld [vmem:[%s956_s9 + $0x30] sm:$0xff] }
  0x97   : > { %352 = vmatmul.f32.gmra.mxu0 %v297_v63  ;;  %417 = vmatmul.f32.gmra.mxu1 %v298_v0 }
  0xdc   : > { %v332_v1 = vpop.f32.mrf.mxu0  ;;  %v397_v3 = vpop.f32.mrf.mxu1 }
  0xdd   : > { %v398_v4 = vadd.f32 %v397_v3, %v332_v1  ;;  %v281_v3 = vld [vmem:[%s956_s9 + $0x70] sm:$0xff] }
  0xdf   : > { %v445_v5 = vadd.f32 %v398_v4, %v267_v2 }
  0xe0   : > { %v356_v6 = vpop.f32.mrf.mxu2 }
  0xe1   : > { %v421_v8 = vpop.f32.mrf.mxu3  ;;  %461 = vst [vmem:[%s956_s9] sm:$0xff] %v445_v5 }
  0xe2   : > { %v422_v9 = vadd.f32 %v421_v8, %v356_v6  ;;  %v274_v8 = vld [vmem:[%s956_s9 + $0x38] sm:$0xff] }
  0xe4   : > { %v453_v10 = vadd.f32 %v422_v9, %v275_v7  ;;  %v335_v11 = vpop.f32.mrf.mxu0  ;;  %v400_v13 = vpop.f32.mrf.mxu1 }
  0xe5   : > { %v401_v14 = vadd.f32 %v400_v13, %v335_v11  ;;  %v282_v13 = vld [vmem:[%s956_s9 + $0x78] sm:$0xff] }
  0xe6   : > { %469 = vst [vmem:[%s956_s9 + $0x40] sm:$0xff] %v453_v10 }
  0xe7   : > { %v446_v15 = vadd.f32 %v401_v14, %v268_v12 }
  0xe8   : > { %v359_v16 = vpop.f32.mrf.mxu2 }
  0xe9   : > { %v424_v18 = vpop.f32.mrf.mxu3  ;;  %462 = vst [vmem:[%s956_s9 + $0x8] sm:$0xff] %v446_v15 }
  0xea   : > { %v425_v19 = vadd.f32 %v424_v18, %v359_v16 }
  0xec   : > { %v454_v20 = vadd.f32 %v425_v19, %v276_v17  ;;  %v338_v21 = vpop.f32.mrf.mxu0  ;;  %v403_v23 = vpop.f32.mrf.mxu1 }
  0xed   : > { %v404_v24 = vadd.f32 %v403_v23, %v338_v21 }
  0xee   : > { %470 = vst [vmem:[%s956_s9 + $0x48] sm:$0xff] %v454_v20 }
  0xef   : > { %v447_v25 = vadd.f32 %v404_v24, %v269_v22 }
  0xf0   : > { %v362_v26 = vpop.f32.mrf.mxu2 }
  0xf1   : > { %v427_v28 = vpop.f32.mrf.mxu3  ;;  %463 = vst [vmem:[%s956_s9 + $0x10] sm:$0xff] %v447_v25 }
  0xf2   : > { %v428_v29 = vadd.f32 %v427_v28, %v362_v26 }
  0xf4   : > { %v455_v30 = vadd.f32 %v428_v29, %v277_v27  ;;  %v341_v31 = vpop.f32.mrf.mxu0  ;;  %v406_v33 = vpop.f32.mrf.mxu1 }
  0xf5   : > { %v407_v34 = vadd.f32 %v406_v33, %v341_v31 }
  0xf6   : > { %471 = vst [vmem:[%s956_s9 + $0x50] sm:$0xff] %v455_v30 }
  0xf7   : > { %v448_v35 = vadd.f32 %v407_v34, %v270_v32 }
  0xf8   : > { %v365_v36 = vpop.f32.mrf.mxu2 }
  0xf9   : > { %v430_v38 = vpop.f32.mrf.mxu3  ;;  %464 = vst [vmem:[%s956_s9 + $0x18] sm:$0xff] %v448_v35 }
  0xfa   : > { %v431_v39 = vadd.f32 %v430_v38, %v365_v36 }
  0xfc   : > { %v456_v40 = vadd.f32 %v431_v39, %v278_v37  ;;  %v344_v41 = vpop.f32.mrf.mxu0  ;;  %v409_v43 = vpop.f32.mrf.mxu1 }
  0xfd   : > { %v410_v44 = vadd.f32 %v409_v43, %v344_v41 }
  0xfe   : > { %472 = vst [vmem:[%s956_s9 + $0x58] sm:$0xff] %v456_v40 }
  0xff   : > { %v449_v45 = vadd.f32 %v410_v44, %v271_v42 }
 0x100   : > { %v368_v46 = vpop.f32.mrf.mxu2 }
 0x101   : > { %v433_v48 = vpop.f32.mrf.mxu3  ;;  %465 = vst [vmem:[%s956_s9 + $0x20] sm:$0xff] %v449_v45 }
 0x102   : > { %v434_v49 = vadd.f32 %v433_v48, %v368_v46 }
 0x104   : > { %v457_v50 = vadd.f32 %v434_v49, %v279_v47  ;;  %v347_v51 = vpop.f32.mrf.mxu0  ;;  %v412_v53 = vpop.f32.mrf.mxu1 }
 0x105   : > { %v413_v54 = vadd.f32 %v412_v53, %v347_v51 }
 0x106   : > { %473 = vst [vmem:[%s956_s9 + $0x60] sm:$0xff] %v457_v50 }
 0x107   : > { %v450_v55 = vadd.f32 %v413_v54, %v272_v52 }
 0x108   : > { %v371_v56 = vpop.f32.mrf.mxu2 }
 0x109   : > { %v436_v58 = vpop.f32.mrf.mxu3  ;;  %466 = vst [vmem:[%s956_s9 + $0x28] sm:$0xff] %v450_v55 }
 0x10a   : > { %v437_v59 = vadd.f32 %v436_v58, %v371_v56 }
 0x10c   : > { %v458_v60 = vadd.f32 %v437_v59, %v280_v57  ;;  %v350_v61 = vpop.f32.mrf.mxu0  ;;  %v415_v63 = vpop.f32.mrf.mxu1 }
 0x10d   : > { %v416_v0 = vadd.f32 %v415_v63, %v350_v61 }
 0x10e   : > { %474 = vst [vmem:[%s956_s9 + $0x68] sm:$0xff] %v458_v60 }
 0x10f   : > { %v451_v1 = vadd.f32 %v416_v0, %v273_v62 }
 0x110   : > { %v374_v2 = vpop.f32.mrf.mxu2 }
 0x111   : > { %v439_v4 = vpop.f32.mrf.mxu3  ;;  %467 = vst [vmem:[%s956_s9 + $0x30] sm:$0xff] %v451_v1 }
 0x112   : > { %v440_v5 = vadd.f32 %v439_v4, %v374_v2 }
 0x114   : > { %v459_v6 = vadd.f32 %v440_v5, %v281_v3  ;;  %v353_v7 = vpop.f32.mrf.mxu0  ;;  %v418_v9 = vpop.f32.mrf.mxu1 }
 0x115   : > { %v419_v10 = vadd.f32 %v418_v9, %v353_v7 }
 0x116   : > { %475 = vst [vmem:[%s956_s9 + $0x70] sm:$0xff] %v459_v6 }
 0x117   : > { %v452_v11 = vadd.f32 %v419_v10, %v274_v8 }
 0x118   : > { %v377_v12 = vpop.f32.mrf.mxu2 }
 0x119   : > { %v442_v14 = vpop.f32.mrf.mxu3  ;;  %468 = vst [vmem:[%s956_s9 + $0x38] sm:$0xff] %v452_v11 }
 0x11a   : > { %v443_v15 = vadd.f32 %v442_v14, %v377_v12  ;;  %480 = sbr.rel (%p632_p2) target bundleno = 307 (0x133), region = 44 }
 0x11c   : > { %v460_v16 = vadd.f32 %v443_v15, %v282_v13 }
 0x11e   : > { %476 = vst [vmem:[%s956_s9 + $0x78] sm:$0xff] %v460_v16 }
 0x11f   : > { %v481_v17 = vld [vmem:[%s956_s9] sm:$0xff]  ;;  %v482_v19 = vld [vmem:[%s956_s9 + $0x8] sm:$0xff]  ;;  %v483_v20 = vld [vmem:[%s956_s9 + $0x10] sm:$0xff] }
 0x120   : > { %v743_v18 = vld [vmem:[%s1139_s2] ss:$0 sm:$0xff]  ;;  %v484_v21 = vld [vmem:[%s956_s9 + $0x18] sm:$0xff]  ;;  %v486_v26 = vld [vmem:[%s956_s9 + $0x28] sm:$0xff] }
 0x121   : > { %v501_v22 = vadd.f32 %v743_v18, %v481_v17  ;;  %v502_v23 = vadd.f32 %v743_v18, %v482_v19  ;;  %v503_v24 = vadd.f32 %v743_v18, %v483_v20  ;;  %v485_v25 = vld [vmem:[%s956_s9 + $0x20] sm:$0xff]  ;;  %v504_v27 = vadd.f32 %v743_v18, %v484_v21  ;;  %v487_v28 = vld [vmem:[%s956_s9 + $0x30] sm:$0xff]  ;;  %v488_v30 = vld [vmem:[%s956_s9 + $0x38] sm:$0xff] }
 0x122   : > { %v505_v29 = vadd.f32 %v743_v18, %v485_v25  ;;  %v506_v31 = vadd.f32 %v743_v18, %v486_v26  ;;  %v489_v32 = vld [vmem:[%s956_s9 + $0x40] sm:$0xff]  ;;  %v507_v33 = vadd.f32 %v743_v18, %v487_v28  ;;  %v490_v34 = vld [vmem:[%s956_s9 + $0x48] sm:$0xff]  ;;  %v508_v35 = vadd.f32 %v743_v18, %v488_v30  ;;  %v491_v36 = vld [vmem:[%s956_s9 + $0x50] sm:$0xff] }
 0x123   : > { %517 = vst [vmem:[%s956_s9] sm:$0xff] %v501_v22  ;;  %v509_v37 = vadd.f32 %v743_v18, %v489_v32  ;;  %v492_v38 = vld [vmem:[%s956_s9 + $0x58] sm:$0xff]  ;;  %v510_v39 = vadd.f32 %v743_v18, %v490_v34  ;;  %v493_v40 = vld [vmem:[%s956_s9 + $0x60] sm:$0xff]  ;;  %v511_v41 = vadd.f32 %v743_v18, %v491_v36  ;;  %v494_v42 = vld [vmem:[%s956_s9 + $0x68] sm:$0xff] }
 0x124   : > { %518 = vst [vmem:[%s956_s9 + $0x8] sm:$0xff] %v502_v23  ;;  %v512_v43 = vadd.f32 %v743_v18, %v492_v38  ;;  %v495_v44 = vld [vmem:[%s956_s9 + $0x70] sm:$0xff]  ;;  %v513_v45 = vadd.f32 %v743_v18, %v493_v40  ;;  %v514_v47 = vadd.f32 %v743_v18, %v494_v42 }
 0x125   : > { %519 = vst [vmem:[%s956_s9 + $0x10] sm:$0xff] %v503_v24  ;;  %v496_v46 = vld [vmem:[%s956_s9 + $0x78] sm:$0xff]  ;;  %v515_v48 = vadd.f32 %v743_v18, %v495_v44 }
 0x126   : > { %520 = vst [vmem:[%s956_s9 + $0x18] sm:$0xff] %v504_v27  ;;  %v516_v49 = vadd.f32 %v743_v18, %v496_v46 }
 0x127   : > { %521 = vst [vmem:[%s956_s9 + $0x20] sm:$0xff] %v505_v29 }
 0x128   : > { %522 = vst [vmem:[%s956_s9 + $0x28] sm:$0xff] %v506_v31 }
 0x129   : > { %523 = vst [vmem:[%s956_s9 + $0x30] sm:$0xff] %v507_v33 }
 0x12a   : > { %524 = vst [vmem:[%s956_s9 + $0x38] sm:$0xff] %v508_v35 }
 0x12b   : > { %525 = vst [vmem:[%s956_s9 + $0x40] sm:$0xff] %v509_v37 }
 0x12c   : > { %526 = vst [vmem:[%s956_s9 + $0x48] sm:$0xff] %v510_v39 }
 0x12d   : > { %527 = vst [vmem:[%s956_s9 + $0x50] sm:$0xff] %v511_v41 }
 0x12e   : > { %528 = vst [vmem:[%s956_s9 + $0x58] sm:$0xff] %v512_v43 }
 0x12f   : > { %529 = vst [vmem:[%s956_s9 + $0x60] sm:$0xff] %v513_v45 }
 0x130   : > { %530 = vst [vmem:[%s956_s9 + $0x68] sm:$0xff] %v514_v47 }
 0x131   : > { %531 = vst [vmem:[%s956_s9 + $0x70] sm:$0xff] %v515_v48 }
 0x132   : > { %532 = vst [vmem:[%s956_s9 + $0x78] sm:$0xff] %v516_v49 }
 0x133 PF: > { %s16_s19 = sadd.s32 1, %s840_s19   ;;  %s1145_s24 = sld [smem:[#allocation5_spill]] }
 0x134   : > { %p13_p3 = scmp.ge.s32.totalorder %s16_s19, 10   ;;  %s1146_s12 = smov %s816_s13 }
 0x135   : > { %s1147_s13 = smov %s820_s14  ;;  %s1148_s14 = smov %s933_s5 }
 0x136   : > { %s1149_s15 = smov %s832_s17  ;;  %s1150_s16 = smov %s836_s18 }
 0x137   : > { %s1151_s17 = smov %s1154_s21  ;;  %15 = sbr.rel (!%p13_p3) target bundleno = 5 (0x5), region = 81 }
 0x139   : > { %s1152_s18 = smov %s1145_s24 }
 0x13c   :  { %555 = vsyncpa [#allocation3], 1 }
 0x13d   :  { %557 = vsyncpa [#allocation3 + $0x1], 1 }

</bundles_post_ra>
